<compile_context>
chip_gen: v5e
topology: v5e:2x2
jax: 0.10.0
libtpu: 0.0.40
codegen_flags: <defaults>
</compile_context>

<pallas_src>
import functools
import math

import jax
import jax.numpy as jnp
from jax.experimental import pallas as pl
from jax.experimental.pallas import tpu as pltpu


def _round_up(n, m):
    return ((n + m - 1) // m) * m


def _cdiv(a, b):
    return (a + b - 1) // b


def _num_tensorcores():
    """Best-effort count of TensorCores addressable by one grid ("parallel"
    axis shards across them). Conservative fallback: 1."""
    try:
        kind = getattr(jax.devices()[0], "device_kind", "") or ""
        kind = kind.lower()
        if ("v7" in kind) or ("7x" in kind) or ("v4" in kind) or ("v5p" in kind):
            return 2
        return 1
    except Exception:  # noqa: BLE001 - purely advisory
        return 1


def _mlp_kernel(x_ref, *refs, n_hidden):
    """Fused MLP forward for one batch tile.

    refs = (w_1, b_1, ..., w_L, b_L, o_ref). Eval-mode BatchNorm is already
    folded into the weights/biases by the wrapper, so hidden layers are just
    Linear -> ReLU and the output layer is a plain Linear.
    """
    o_ref = refs[-1]
    wb = refs[:-1]

    h = x_ref[...]
    for li in range(n_hidden + 1):
        w_ref = wb[2 * li]
        b_ref = wb[2 * li + 1]
        if h.dtype != w_ref.dtype:
            # Only needed for layers >= 1 on the bf16 path (layer 0's cast is
            # done once in the wrapper to also halve the x DMA bytes).
            h = h.astype(w_ref.dtype)
        h = jnp.dot(h, w_ref[...], preferred_element_type=jnp.float32)
        h = h + b_ref[...]                 # (1, H) f32 bias broadcasts over batch
        if li < n_hidden:
            h = jnp.maximum(h, 0.0)        # ReLU (BN folded, Dropout = identity)
    o_ref[...] = h.astype(o_ref.dtype)


def audio_classifier_forward(x, kernel_params, num_classes, *,
                             batch_tile=1024, out_dtype=jnp.float32):
    """Runs the fused classifier kernel.

    x: [B, input_dim] float32.
    kernel_params: flat tuple (w1, b1, ..., wL, bL) from fold_and_pack_params
      (BN folded, class dim padded to a multiple of 8).
    Returns [B, num_classes] logits in `out_dtype`.
    """
    B, D = x.shape
    n_layers = len(kernel_params) // 2
    c_pad = kernel_params[-1].shape[-1]
    w_dtype = kernel_params[0].dtype

    # bf16 weights -> stream x as bf16 too (halves the input DMA bytes and
    # removes one VPU cast pass per tile). Accumulation stays f32 on the MXU.
    if w_dtype == jnp.bfloat16:
        x = x.astype(jnp.bfloat16)

    # Batch tile from a step count: bounds pad waste to < 8 rows per step
    # (vs. padding B up to a multiple of a fixed tile). On 2-TC parts force
    # >= 2 steps so both cores get work via the "parallel" grid axis.
    cap = max(8, _round_up(int(batch_tile), 8))
    min_steps = 2 if (_num_tensorcores() >= 2 and B > 16) else 1
    steps = max(min_steps, _cdiv(B, cap))
    bt = _round_up(_cdiv(B, steps), 8)
    b_pad = steps * bt
    if b_pad != B:
        x = jnp.pad(x, ((0, b_pad - B), (0, 0)))

    # Advisory cost estimate so XLA can schedule/overlap around this call.
    flops = 0
    din = D
    for li in range(n_layers):
        dout = kernel_params[2 * li].shape[1]
        flops += 2 * b_pad * din * dout
        din = dout
    param_bytes = sum(int(p.size) * p.dtype.itemsize for p in kernel_params)
    out_itemsize = jnp.dtype(out_dtype).itemsize
    bytes_accessed = (int(x.size) * x.dtype.itemsize + param_bytes
                      + b_pad * c_pad * out_itemsize)
    cost = pl.CostEstimate(flops=flops, transcendentals=0,
                           bytes_accessed=bytes_accessed)

    in_specs = [pl.BlockSpec((bt, D), lambda i: (i, 0))]          # x tile
    for li in range(n_layers):
        w, b = kernel_params[2 * li], kernel_params[2 * li + 1]
        in_specs.append(pl.BlockSpec(w.shape, lambda i: (0, 0)))  # full weight
        in_specs.append(pl.BlockSpec(b.shape, lambda i: (0, 0)))  # full bias

    out = pl.pallas_call(
        functools.partial(_mlp_kernel, n_hidden=n_layers - 1),
        out_shape=jax.ShapeDtypeStruct((b_pad, c_pad), out_dtype),
        grid_spec=pl.GridSpec(
            grid=(steps,),
            in_specs=in_specs,
            out_specs=pl.BlockSpec((bt, c_pad), lambda i: (i, 0)),
        ),
        compiler_params=pltpu.CompilerParams(
            dimension_semantics=("parallel",)),   # batch tiles shard across TCs
        cost_estimate=cost,
    )(x, *kernel_params)

    return out[:B, :num_classes]


def init_params_raw(key, input_dim, hidden_dims, num_classes):
    """PyTorch-shaped parameters: per hidden layer
    (W[in,out], b[1,out], gamma, beta, running_mean, running_var), plus the
    final (W[in,classes], b[1,classes])."""
    dims = [input_dim] + list(hidden_dims)
    n_lin = len(hidden_dims) + 1
    keys = jax.random.split(key, 2 * n_lin)
    hidden = []
    ki = 0
    for li, dout in enumerate(hidden_dims):
        din = dims[li]
        bound = 1.0 / math.sqrt(din)
        w = jax.random.uniform(keys[ki], (din, dout), jnp.float32, -bound, bound)
        b = jax.random.uniform(keys[ki + 1], (1, dout), jnp.float32, -bound, bound)
        ki += 2
        gamma = jnp.ones((1, dout), jnp.float32)
        beta = jnp.zeros((1, dout), jnp.float32)
        r_mean = jnp.zeros((1, dout), jnp.float32)
        r_var = jnp.ones((1, dout), jnp.float32)
        hidden.append((w, b, gamma, beta, r_mean, r_var))
    din = dims[-1]
    bound = 1.0 / math.sqrt(din)
    wf = jax.random.uniform(keys[ki], (din, num_classes), jnp.float32, -bound, bound)
    bf = jax.random.uniform(keys[ki + 1], (1, num_classes), jnp.float32, -bound, bound)
    return hidden, (wf, bf)


def fold_and_pack_params(raw, *, weight_dtype=jnp.float32, class_pad=8):
    """Fold eval-mode BatchNorm1d of hidden layer k into layer k+1's Linear:
        W' = scale[:, None] * W,   b' = b + shift @ W
    (exact in f32, since BN follows ReLU and the next op is linear), and
    zero-pad the final class dimension to a multiple of `class_pad` (small pad
    keeps the output HBM stream tight; padded logits are exactly 0)."""
    eps = 1e-5
    hidden, (wf, bf) = raw
    packed = []
    scale = None
    shift = None
    for (w, b, gamma, beta, r_mean, r_var) in hidden:
        if scale is not None:
            b = b + shift @ w                  # uses the original W
            w = scale.reshape(-1, 1) * w
        scale = gamma / jnp.sqrt(r_var + eps)  # (1, dout) folded BN
        shift = beta - r_mean * scale
        packed += [w.astype(weight_dtype), b.astype(jnp.float32)]
    if scale is not None:
        bf = bf + shift @ wf
        wf = scale.reshape(-1, 1) * wf
    c = wf.shape[1]
    c_pad = _round_up(c, class_pad)
    if c_pad != c:
        wf = jnp.pad(wf, ((0, 0), (0, c_pad - c)))
        bf = jnp.pad(bf, ((0, 0), (0, c_pad - c)))
    packed += [wf.astype(weight_dtype), bf.astype(jnp.float32)]
    return tuple(packed)


def reference_forward(x, raw):
    """Pure-JAX eval-mode reference (unfolded BN, Dropout = identity)."""
    eps = 1e-5
    hidden, (wf, bf) = raw
    h = x
    for (w, b, gamma, beta, r_mean, r_var) in hidden:
        h = jnp.maximum(h @ w + b, 0.0)
        h = (h - r_mean) / jnp.sqrt(r_var + eps) * gamma + beta
    return h @ wf + bf


if __name__ == "__main__":
    input_dim = 32
    hidden_dims = [64, 32]
    num_classes = 2
    batch = 8

    key = jax.random.PRNGKey(0)
    k_x, k_p = jax.random.split(key)
    x = jax.random.normal(k_x, (batch, input_dim), jnp.float32)
    raw = init_params_raw(k_p, input_dim, hidden_dims, num_classes)
    ref = reference_forward(x, raw)

    # f32 weights, f32 logits: exact-path check.
    kparams_f32 = fold_and_pack_params(raw, weight_dtype=jnp.float32)
    logits = jax.block_until_ready(
        audio_classifier_forward(x, kparams_f32, num_classes))
    assert logits.shape == (batch, num_classes)
    assert jnp.allclose(logits, ref, atol=1e-4, rtol=1e-4)

    # Ragged batch: exercises step-count-derived tiling and a multi-step
    # parallel grid (steps=3, bt=104, 12 padded rows for B=300).
    x_rag = jax.random.normal(jax.random.PRNGKey(1), (300, input_dim), jnp.float32)
    out_rag = jax.block_until_ready(
        audio_classifier_forward(x_rag, kparams_f32, num_classes, batch_tile=128))
    assert out_rag.shape == (300, num_classes)
    assert jnp.allclose(out_rag, reference_forward(x_rag, raw),
                        atol=1e-4, rtol=1e-4)

    # bf16 weights + bf16 x stream (MXU-native on all generations), f32
    # accumulation, optional bf16 logits: loose checks.
    kparams_bf16 = fold_and_pack_params(raw, weight_dtype=jnp.bfloat16)
    logits_bf16 = jax.block_until_ready(
        audio_classifier_forward(x, kparams_bf16, num_classes))
    assert logits_bf16.shape == (batch, num_classes)
    assert jnp.allclose(logits_bf16, ref, atol=1e-1, rtol=1e-1)

    logits_bf16_out = jax.block_until_ready(
        audio_classifier_forward(x, kparams_bf16, num_classes,
                                 out_dtype=jnp.bfloat16))
    assert logits_bf16_out.dtype == jnp.bfloat16
    assert jnp.allclose(logits_bf16_out.astype(jnp.float32), ref,
                        atol=1e-1, rtol=1e-1)

    print("KERNEL_OK")
</pallas_src>

<mosaic_0001>
module attributes {stable_mosaic.version = 11 : i64} {
  func.func @_mlp_kernel(%arg0: i32, %arg1: memref<8x32xf32, #tpu.memory_space<vmem>>, %arg2: memref<32x64xf32, #tpu.memory_space<vmem>>, %arg3: memref<1x64xf32, #tpu.memory_space<vmem>>, %arg4: memref<64x32xf32, #tpu.memory_space<vmem>>, %arg5: memref<1x32xf32, #tpu.memory_space<vmem>>, %arg6: memref<32x8xf32, #tpu.memory_space<vmem>>, %arg7: memref<1x8xf32, #tpu.memory_space<vmem>>, %arg8: memref<8x8xf32, #tpu.memory_space<vmem>>) attributes {dimension_semantics = [#tpu.dimension_semantics<parallel>], iteration_bounds = array<i64: 1>, scalar_prefetch = 0 : i64, scratch_operands = 0 : i64, tpu.core_type = #tpu.core_type<tc>, window_params = [{transform_indices = @transform_0, window_bounds = array<i64: 8, 32>}, {pipeline_mode = #tpu.pipeline_mode<synchronous>, transform_indices = @transform_1, window_bounds = array<i64: 32, 64>}, {pipeline_mode = #tpu.pipeline_mode<synchronous>, transform_indices = @transform_2, window_bounds = array<i64: 1, 64>}, {pipeline_mode = #tpu.pipeline_mode<synchronous>, transform_indices = @transform_3, window_bounds = array<i64: 64, 32>}, {pipeline_mode = #tpu.pipeline_mode<synchronous>, transform_indices = @transform_4, window_bounds = array<i64: 1, 32>}, {pipeline_mode = #tpu.pipeline_mode<synchronous>, transform_indices = @transform_5, window_bounds = array<i64: 32, 8>}, {pipeline_mode = #tpu.pipeline_mode<synchronous>, transform_indices = @transform_6, window_bounds = array<i64: 1, 8>}, {transform_indices = @transform_7, window_bounds = array<i64: 8, 8>}]} {
    %c0 = arith.constant 0 : index
    %c0_0 = arith.constant 0 : index
    %0 = vector.load %arg1[%c0, %c0_0] : memref<8x32xf32, #tpu.memory_space<vmem>>, vector<8x32xf32>
    %c0_1 = arith.constant 0 : index
    %c0_2 = arith.constant 0 : index
    %1 = vector.load %arg2[%c0_1, %c0_2] : memref<32x64xf32, #tpu.memory_space<vmem>>, vector<32x64xf32>
    %cst = arith.constant dense<0.000000e+00> : vector<8x64xf32>
    %2 = tpu.matmul %0, %1, %cst {dimension_numbers = #tpu.dot_dimension_numbers<[1], [0], [0], [1], [0, 0, 1, 1], [], []>} : vector<8x32xf32>, vector<32x64xf32>, vector<8x64xf32> -> vector<8x64xf32>
    %c0_3 = arith.constant 0 : index
    %c0_4 = arith.constant 0 : index
    %3 = vector.load %arg3[%c0_3, %c0_4] : memref<1x64xf32, #tpu.memory_space<vmem>>, vector<1x64xf32>
    %4 = vector.broadcast %3 : vector<1x64xf32> to vector<8x64xf32>
    %5 = arith.addf %2, %4 : vector<8x64xf32>
    %cst_5 = arith.constant 0.000000e+00 : f32
    %6 = vector.broadcast %cst_5 : f32 to vector<8x64xf32>
    %7 = arith.maximumf %5, %6 : vector<8x64xf32>
    %c0_6 = arith.constant 0 : index
    %c0_7 = arith.constant 0 : index
    %8 = vector.load %arg4[%c0_6, %c0_7] : memref<64x32xf32, #tpu.memory_space<vmem>>, vector<64x32xf32>
    %cst_8 = arith.constant dense<0.000000e+00> : vector<8x32xf32>
    %9 = tpu.matmul %7, %8, %cst_8 {dimension_numbers = #tpu.dot_dimension_numbers<[1], [0], [0], [1], [0, 0, 1, 1], [], []>} : vector<8x64xf32>, vector<64x32xf32>, vector<8x32xf32> -> vector<8x32xf32>
    %c0_9 = arith.constant 0 : index
    %c0_10 = arith.constant 0 : index
    %10 = vector.load %arg5[%c0_9, %c0_10] : memref<1x32xf32, #tpu.memory_space<vmem>>, vector<1x32xf32>
    %11 = vector.broadcast %10 : vector<1x32xf32> to vector<8x32xf32>
    %12 = arith.addf %9, %11 : vector<8x32xf32>
    %cst_11 = arith.constant 0.000000e+00 : f32
    %13 = vector.broadcast %cst_11 : f32 to vector<8x32xf32>
    %14 = arith.maximumf %12, %13 : vector<8x32xf32>
    %c0_12 = arith.constant 0 : index
    %c0_13 = arith.constant 0 : index
    %15 = vector.load %arg6[%c0_12, %c0_13] : memref<32x8xf32, #tpu.memory_space<vmem>>, vector<32x8xf32>
    %cst_14 = arith.constant dense<0.000000e+00> : vector<8x8xf32>
    %16 = tpu.matmul %14, %15, %cst_14 {dimension_numbers = #tpu.dot_dimension_numbers<[1], [0], [0], [1], [0, 0, 1, 1], [], []>} : vector<8x32xf32>, vector<32x8xf32>, vector<8x8xf32> -> vector<8x8xf32>
    %c0_15 = arith.constant 0 : index
    %c0_16 = arith.constant 0 : index
    %17 = vector.load %arg7[%c0_15, %c0_16] : memref<1x8xf32, #tpu.memory_space<vmem>>, vector<1x8xf32>
    %18 = vector.broadcast %17 : vector<1x8xf32> to vector<8x8xf32>
    %19 = arith.addf %16, %18 : vector<8x8xf32>
    %c0_17 = arith.constant 0 : index
    %c0_18 = arith.constant 0 : index
    %20 = vector.load %arg8[%c0_17, %c0_18] : memref<8x8xf32, #tpu.memory_space<vmem>>, vector<8x8xf32>
    tpu.vector_store %arg8[%c0_17, %c0_18], %19 {strides = array<i32>} : memref<8x8xf32, #tpu.memory_space<vmem>>, vector<8x8xf32>,
    return
  }
  func.func @transform_0(%arg0: i32) -> (i32, i32) {
    %c0_i32 = arith.constant 0 : i32
    %c0_i32_0 = arith.constant 0 : i32
    return %arg0, %c0_i32 : i32, i32
  }
  func.func @transform_1(%arg0: i32) -> (i32, i32) {
    %c0_i32 = arith.constant 0 : i32
    %c0_i32_0 = arith.constant 0 : i32
    %c0_i32_1 = arith.constant 0 : i32
    return %c0_i32, %c0_i32_0 : i32, i32
  }
  func.func @transform_2(%arg0: i32) -> (i32, i32) {
    %c0_i32 = arith.constant 0 : i32
    %c0_i32_0 = arith.constant 0 : i32
    %c0_i32_1 = arith.constant 0 : i32
    return %c0_i32, %c0_i32_0 : i32, i32
  }
  func.func @transform_3(%arg0: i32) -> (i32, i32) {
    %c0_i32 = arith.constant 0 : i32
    %c0_i32_0 = arith.constant 0 : i32
    %c0_i32_1 = arith.constant 0 : i32
    return %c0_i32, %c0_i32_0 : i32, i32
  }
  func.func @transform_4(%arg0: i32) -> (i32, i32) {
    %c0_i32 = arith.constant 0 : i32
    %c0_i32_0 = arith.constant 0 : i32
    %c0_i32_1 = arith.constant 0 : i32
    return %c0_i32, %c0_i32_0 : i32, i32
  }
  func.func @transform_5(%arg0: i32) -> (i32, i32) {
    %c0_i32 = arith.constant 0 : i32
    %c0_i32_0 = arith.constant 0 : i32
    %c0_i32_1 = arith.constant 0 : i32
    return %c0_i32, %c0_i32_0 : i32, i32
  }
  func.func @transform_6(%arg0: i32) -> (i32, i32) {
    %c0_i32 = arith.constant 0 : i32
    %c0_i32_0 = arith.constant 0 : i32
    %c0_i32_1 = arith.constant 0 : i32
    return %c0_i32, %c0_i32_0 : i32, i32
  }
  func.func @transform_7(%arg0: i32) -> (i32, i32) {
    %c0_i32 = arith.constant 0 : i32
    %c0_i32_0 = arith.constant 0 : i32
    return %arg0, %c0_i32 : i32, i32
  }
}

</mosaic_0001>

<bundles_post_ra>
// kernel: tpu_custom_call.1
= control target key start
LH: loop header
LB: loop body
LE: loop exit
PB: predicated region body
PF: predicated region fallthrough
CT: control target
= control target key end

     0   :  { %s286_s0 = inlined_call_operand.vmem [shape: f32[8,32], index: 0, kind: input, shape index: {}]   ;;  %s287_s1 = inlined_call_operand.vmem [shape: f32[32,64], index: 1, kind: input, shape index: {}]   ;;  %s288_s2 = inlined_call_operand.vmem [shape: f32[1,64], index: 2, kind: input, shape index: {}]   ;;  %s289_s3 = inlined_call_operand.vmem [shape: f32[64,32], index: 3, kind: input, shape index: {}]   ;;  %s290_s4 = inlined_call_operand.vmem [shape: f32[1,32], index: 4, kind: input, shape index: {}]   ;;  %s291_s5 = inlined_call_operand.vmem [shape: f32[32,8], index: 5, kind: input, shape index: {}]   ;;  %s292_s6 = inlined_call_operand.vmem [shape: f32[1,8], index: 6, kind: input, shape index: {}]   ;;  %s293_s7 = inlined_call_operand.hbm [shape: f32[8,8], index: 7, kind: output, shape index: {}]  }
   0x1   :  { %v31_v0 = vld [vmem:[%s287_s1 + $0x18] sm:$0xff]  ;;  %v30_v1 = vld [vmem:[%s287_s1 + $0x10] sm:$0xff]  ;;  %v29_v3 = vld [vmem:[%s287_s1 + $0x8] sm:$0xff] }
   0x2   :  { %52 = vmatpush.msra.mxu0 %v31_v0  ;;  %v68_v2 = vld [vmem:[%s289_s3 + $0x38] sm:$0xff]  ;;  %v67_v4 = vld [vmem:[%s289_s3 + $0x30] sm:$0xff]  ;;  %v28_v5 = vld [vmem:[%s287_s1] sm:$0xff] }
   0x3   :  { %85 = vmatpush.msra.mxu1 %v68_v2  ;;  %v66_v6 = vld [vmem:[%s289_s3 + $0x28] sm:$0xff] }
   0x4   :  { %53 = vmatpush.msra.mxu0 %v30_v1 }
   0x5   :  { %86 = vmatpush.msra.mxu1 %v67_v4 }
   0x6   :  { %12 = vsyncpa [#allocation3], 0  ;;  %54 = vmatpush.msra.mxu0 %v29_v3  ;;  %v27_v7 = vld [vmem:[%s286_s0] sm:$0xff]  ;;  %vm36_vm0 = vcmask 261120   ;;  %v64_v9 = vld [vmem:[%s289_s3 + $0x18] sm:$0xff]  ;;  %vm73_vm1 = vcmask 523264  }
   0x7   :  { %v65_v8 = vld [vmem:[%s289_s3 + $0x20] sm:$0xff]  ;;  %87 = vmatpush.msra.mxu1 %v66_v6  ;;  %v63_v10 = vld [vmem:[%s289_s3 + $0x10] sm:$0xff]  ;;  %v62_v11 = vld [vmem:[%s289_s3 + $0x8] sm:$0xff]  ;;  %s180_s14 = smov [#allocation2]   ;;  %vm129_vm2 = vcmask 64512  }
   0x8   :  { %55 = vmatpush.msra.mxu0 %v28_v5  ;;  %v61_v12 = vld [vmem:[%s289_s3] sm:$0xff]  ;;  %v101_v13 = vld [vmem:[%s291_s5 + $0x18] sm:$0xff]  ;;  %v100_v18 = vld [vmem:[%s291_s5 + $0x10] sm:$0xff]  ;;  %s136_s15 = sshll.u32 %s180_s14, 4  ;;  %s137_s15 = int_to_ptr.vmem [resolvable:$true] %s136_s15 }
   0x9   :  { %147 = vmatmul.msk.f32.vlgmr.msra.gmra.mxu0 %vm36_vm0, %v27_v7  ;;  %88 = vmatpush.msra.mxu1 %v65_v8  ;;  %v151_v14 = vld [vmem:[%s288_s2] ss:$0 sm:$0xff]  ;;  %v99_v19 = vld [vmem:[%s291_s5 + $0x8] sm:$0xff] }
   0xa   :  { %121 = vmatpush.msra.mxu2 %v101_v13  ;;  %v98_v20 = vld [vmem:[%s291_s5] sm:$0xff]  ;;  %s138_s5 = sshll.u32 %s293_s7, 4  ;;  %s139_s5 = int_to_ptr.hbm [resolvable:$true] %s138_s5 }
   0xb   :  { %89 = vmatpush.msra.mxu1 %v64_v9  ;;  %v152_v21 = vld [vmem:[%s290_s4] ss:$0 sm:$0xff] }
   0xc   :  { %122 = vmatpush.msra.mxu2 %v100_v18  ;;  %v153_v25 = vld [vmem:[%s292_s6] ss:$0 sm:$0xff] }
   0xd   :  { %90 = vmatpush.msra.mxu1 %v63_v10 }
   0xe   :  { %123 = vmatpush.msra.mxu2 %v99_v19 }
   0xf   :  { %91 = vmatpush.msra.mxu1 %v62_v11 }
  0x10   :  { %124 = vmatpush.msra.mxu2 %v98_v20 }
  0x11   :  { %92 = vmatpush.msra.mxu1 %v61_v12 }
  0x86   :  { %v57_v15 = vpop.f32.mrf.mxu0 }
  0x87   :  { %v58_v16 = vadd.f32 %v151_v14, %v57_v15 }
  0x89   :  { %v60_v17 = vmax.f32 %v58_v16, 0.0 }
  0x8b   :  { %148 = vmatmul.msk.f32.vlgmr.msra.gmra.mxu1 %vm73_vm1, %v60_v17 }
 0x108   :  { %v94_v22 = vpop.f32.mrf.mxu1 }
 0x109   :  { %v95_v23 = vadd.f32 %v152_v21, %v94_v22 }
 0x10b   :  { %v97_v24 = vmax.f32 %v95_v23, 0.0 }
 0x10d   :  { %149 = vmatmul.msk.f32.vlgmr.msra.gmra.mxu2 %vm36_vm0, %v97_v24 }
 0x190   :  { %v126_v26 = vpop.f32.mrf.mxu2 }
 0x191   :  { %v127_v27 = vadd.f32 %v153_v25, %v126_v26 }
 0x193   :  { %130 = vst.msk [vmem:[#allocation2] sm:$0xff] %vm129_vm2, %v127_v27 }
 0x194   :  { %141 = dma.vmem_to_hbm [thread:$0]  %s137_s15, 128, %s139_s5, [#allocation3]  }
 0x195   :  { %178 = dma.done.wait [#allocation3], 128  }
 0x196   :  { %179 = vsyncadd [#allocation3], 4294967168 }
 0x197   :  { %146 = vsyncpa [#allocation3], 1 }

</bundles_post_ra>
